<compile_context>
chip_gen: v7x
topology: tpu7x:2x2x1
jax: 0.10.0
libtpu: 0.0.40
codegen_flags: <defaults>
</compile_context>

<pallas_src>
import functools
import math

import jax
import jax.numpy as jnp
from jax import lax
from jax.experimental import pallas as pl
from jax.experimental.pallas import tpu as pltpu


# ------------------------------ kernels ----------------------------------- #

def _attention_core(q, k, v, o_ref, *, H, Dh, mask_right):
    """Batched (over TB) multi-head attention on projected q/k/v.

    q: [TB, Sq, H*Dh], k/v: [TB, Sk, H*Dh], o_ref: [TB, Sq, H*Dh].
    The 1/sqrt(Dh) scale is already folded into q (via WQ/bQ at init).
    """
    _, Sq, _ = q.shape
    Sk = k.shape[1]

    neg = None
    if mask_right:
        # torch: A = A - tril(ones) * 1e12  (lower triangle incl. diagonal).
        row = lax.broadcasted_iota(jnp.int32, (Sq, Sk), 0)
        col = lax.broadcasted_iota(jnp.int32, (Sq, Sk), 1)
        neg = jnp.where(col <= row, jnp.float32(-1e12), jnp.float32(0.0))

    for h in range(H):                               # static unroll over heads
        sl = slice(h * Dh, (h + 1) * Dh)
        # Scores: contract Dh with TB as batch dim (no transposes / XLU).
        s = jnp.einsum("bqd,bkd->bqk", q[:, :, sl], k[:, :, sl],
                       preferred_element_type=jnp.float32)      # [TB, Sq, Sk]
        if mask_right:
            s = s + neg                                          # broadcast TB
        m = jnp.max(s, axis=-1, keepdims=True)
        e = jnp.exp(s - m)
        p = e * pl.reciprocal(jnp.sum(e, axis=-1, keepdims=True), approx=True)
        oh = jnp.einsum("bqk,bkd->bqd", p, v[:, :, sl],
                        preferred_element_type=jnp.float32)      # [TB, Sq, Dh]
        # Write this head's lane slice of the output block directly.
        o_ref[:, :, sl] = oh.astype(o_ref.dtype)


def _mhsa_shared_kernel(x_ref, w_ref, b_ref, o_ref, *, H, Dh, mask_right):
    """Shared-input path (Q_seq is K_seq is V_seq): one fused QKV projection."""
    HDh = H * Dh
    TB, Sq, D = x_ref.shape
    # Flatten the batch block so the MXU M-dim is TB*Sq; cast to bf16 in-kernel.
    x2 = x_ref[...].reshape(TB * Sq, D).astype(jnp.bfloat16)
    qkv = (jnp.dot(x2, w_ref[...], preferred_element_type=jnp.float32)
           + b_ref[...]).reshape(TB, Sq, 3 * HDh)
    _attention_core(qkv[:, :, :HDh], qkv[:, :, HDh:2 * HDh], qkv[:, :, 2 * HDh:],
                    o_ref, H=H, Dh=Dh, mask_right=mask_right)


def _mhsa_general_kernel(xq_ref, xk_ref, xv_ref,
                         wq_ref, bq_ref, wk_ref, bk_ref, wv_ref, bv_ref,
                         o_ref, *, H, Dh, mask_right):
    """General path: distinct Q/K/V sequences, separate projections."""
    HDh = H * Dh

    def proj(x_ref, w_ref, b_ref):
        TB, S, D = x_ref.shape
        x2 = x_ref[...].reshape(TB * S, D).astype(jnp.bfloat16)
        y = jnp.dot(x2, w_ref[...], preferred_element_type=jnp.float32) + b_ref[...]
        return y.reshape(TB, S, HDh)

    _attention_core(proj(xq_ref, wq_ref, bq_ref),
                    proj(xk_ref, wk_ref, bk_ref),
                    proj(xv_ref, wv_ref, bv_ref),
                    o_ref, H=H, Dh=Dh, mask_right=mask_right)


# ------------------------------ helpers ------------------------------------ #

def _pick_batch_block(B, Sq):
    """Batch elements per grid step.

    Target >= 256 MXU rows for the flattened (TB*Sq, D) projection, but keep
    the grid length >= 2 whenever B allows it so both v7x TensorCores get work
    on the "parallel" batch-block axis (no-op on single-TC v5e/v6e)."""
    tb = max(1, min(B, pl.cdiv(256, Sq)))
    if B >= 2:
        tb = min(tb, pl.cdiv(B, 2))
    return tb


def _vmem_limit(TB, Sq, Sk, D, HDh, shared):
    """Explicit scoped-VMEM budget (bytes), sized from the blocked tiles.

    v5e's default scoped limit is 16 MiB and v7x has only 64 MiB physical
    VMEM, so budget explicitly instead of relying on defaults."""
    f32, bf16 = 4, 2
    seq_blocks = TB * Sq * D * f32 + (0 if shared else 2 * TB * Sk * D * f32)
    w_blocks = D * 3 * HDh * bf16 + 3 * HDh * f32
    o_block = TB * Sq * HDh * f32
    pipelined = 2 * (seq_blocks + w_blocks + o_block)       # double-buffered
    # Live in-kernel temporaries: bf16 x copy, f32 qkv, per-head scores/probs.
    interm = TB * Sq * (D * bf16 + 6 * HDh * f32 + 4 * Sk * f32 + 2 * HDh * f32)
    est = 2 * (pipelined + interm) + (4 << 20)              # 2x headroom
    return int(min(max(est, 16 << 20), 56 << 20))           # safe on v7x too


# ------------------------------ module ------------------------------------- #

class SelfAttentionPallas:
    """JAX/Pallas port of SelfAttention_torch (forward pass)."""

    def __init__(self, multiheads, head_dim, input_dim, seed=0,
                 mask_right=False, batch_block=None):
        self.multiheads = multiheads
        self.head_dim = head_dim
        self.output_dim = multiheads * head_dim
        self.input_dim = input_dim
        self.mask_right = mask_right
        self.batch_block = batch_block

        # Same distribution family as torch.nn.Linear's default init:
        # U(-1/sqrt(fan_in), 1/sqrt(fan_in)).
        key = jax.random.PRNGKey(seed)
        ks = jax.random.split(key, 6)
        bound = 1.0 / math.sqrt(input_dim)

        def u(k, shape):
            return jax.random.uniform(k, shape, jnp.float32,
                                      minval=-bound, maxval=bound)

        N = self.output_dim
        # f32 master copies (used by the pure-JAX reference).
        self.WQ = u(ks[0], (input_dim, N)); self.bQ = u(ks[1], (1, N))
        self.WK = u(ks[2], (input_dim, N)); self.bK = u(ks[3], (1, N))
        self.WV = u(ks[4], (input_dim, N)); self.bV = u(ks[5], (1, N))

        # Kernel copies: 1/sqrt(head_dim) folded into the Q projection once
        # (constant fold, not a per-call op); weights in bf16 (MXU native),
        # biases in f32.
        scale = 1.0 / math.sqrt(float(head_dim))
        self._WQ = (self.WQ * scale).astype(jnp.bfloat16)
        self._bQ = self.bQ * scale
        self._WK = self.WK.astype(jnp.bfloat16); self._bK = self.bK
        self._WV = self.WV.astype(jnp.bfloat16); self._bV = self.bV
        # Fused QKV weight/bias for the shared-input (true self-attention) path.
        self._W_qkv = jnp.concatenate([self._WQ, self._WK, self._WV], axis=1)
        self._b_qkv = jnp.concatenate([self._bQ, self._bK, self._bV], axis=1)

    def __call__(self, Q_seq, K_seq, V_seq, Q_len=None, V_len=None):
        B, Sq, D = Q_seq.shape
        Sk = K_seq.shape[1]
        H, Dh, HDh = self.multiheads, self.head_dim, self.output_dim
        shared = (Q_seq is K_seq) and (K_seq is V_seq)

        TB = self.batch_block or _pick_batch_block(B, Sq)
        TB = max(1, min(TB, B))
        grid = (pl.cdiv(B, TB),)          # padded trailing block is fine:
                                          # per-row math, masked writeback

        if shared:
            kernel = functools.partial(_mhsa_shared_kernel, H=H, Dh=Dh,
                                       mask_right=self.mask_right)
            inputs = [Q_seq, self._W_qkv, self._b_qkv]
            in_specs = [
                pl.BlockSpec((TB, Sq, D), lambda b: (b, 0, 0)),
                pl.BlockSpec((D, 3 * HDh), lambda b: (0, 0)),   # grid-invariant
                pl.BlockSpec((1, 3 * HDh), lambda b: (0, 0)),   # grid-invariant
            ]
        else:
            kernel = functools.partial(_mhsa_general_kernel, H=H, Dh=Dh,
                                       mask_right=self.mask_right)
            inputs = [Q_seq, K_seq, V_seq,
                      self._WQ, self._bQ, self._WK, self._bK, self._WV, self._bV]
            in_specs = [
                pl.BlockSpec((TB, Sq, D), lambda b: (b, 0, 0)),
                pl.BlockSpec((TB, Sk, D), lambda b: (b, 0, 0)),
                pl.BlockSpec((TB, Sk, D), lambda b: (b, 0, 0)),
                pl.BlockSpec((D, HDh), lambda b: (0, 0)),
                pl.BlockSpec((1, HDh), lambda b: (0, 0)),
                pl.BlockSpec((D, HDh), lambda b: (0, 0)),
                pl.BlockSpec((1, HDh), lambda b: (0, 0)),
                pl.BlockSpec((D, HDh), lambda b: (0, 0)),
                pl.BlockSpec((1, HDh), lambda b: (0, 0)),
            ]

        O = pl.pallas_call(
            kernel,
            out_shape=jax.ShapeDtypeStruct((B, Sq, HDh), jnp.float32),
            grid=grid,
            in_specs=in_specs,
            out_specs=pl.BlockSpec((TB, Sq, HDh), lambda b: (b, 0, 0)),
            compiler_params=pltpu.CompilerParams(
                dimension_semantics=("parallel",),        # megacore over batch
                vmem_limit_bytes=_vmem_limit(TB, Sq, Sk, D, HDh, shared),
            ),
        )(*inputs)

        if Q_len is not None:
            # torch _mask(..., mode='mul'): zero out positions >= Q_len.
            mask = (jnp.arange(Sq)[None, :] < Q_len[:, None]).astype(O.dtype)
            O = O * mask[:, :, None]
        return O


# --------------------------- pure-JAX reference ---------------------------- #

def reference(attn, Q_seq, K_seq, V_seq, Q_len=None):
    """Mirrors the torch forward; mimics the kernel's in-kernel bf16 casts."""
    B, Sq, _ = Q_seq.shape
    Sk = K_seq.shape[1]
    H, Dh = attn.multiheads, attn.head_dim
    f32 = jnp.float32

    def proj(x, w, b):
        x16 = x.astype(jnp.bfloat16).astype(f32)
        w16 = w.astype(jnp.bfloat16).astype(f32)
        return jnp.einsum("bsd,dn->bsn", x16, w16) + b

    Q = proj(Q_seq, attn.WQ, attn.bQ).reshape(B, Sq, H, Dh).transpose(0, 2, 1, 3)
    K = proj(K_seq, attn.WK, attn.bK).reshape(B, Sk, H, Dh).transpose(0, 2, 1, 3)
    V = proj(V_seq, attn.WV, attn.bV).reshape(B, Sk, H, Dh).transpose(0, 2, 1, 3)
    A = jnp.einsum("bhqd,bhkd->bhqk", Q, K) / math.sqrt(float(Dh))
    if attn.mask_right:
        A = A - jnp.tril(jnp.ones((Sq, Sk), f32)) * 1e12
    A = jax.nn.softmax(A, axis=-1)
    O = jnp.einsum("bhqk,bhkd->bhqd", A, V)
    O = O.transpose(0, 2, 1, 3).reshape(B, Sq, H * Dh)
    if Q_len is not None:
        mask = (jnp.arange(Sq)[None, :] < Q_len[:, None]).astype(O.dtype)
        O = O * mask[:, :, None]
    return O


if __name__ == "__main__":
    # Small shapes consistent with the module's forward:
    # batch=2, seq=8, input_dim=32, multiheads=4, head_dim=8 (output_dim=32).
    B, S, D_IN = 2, 8, 32
    HEADS, HEAD_DIM = 4, 8

    key = jax.random.PRNGKey(0)
    kx, kq, kk, kv, kx2 = jax.random.split(key, 5)
    x = jax.random.normal(kx, (B, S, D_IN), jnp.float32)
    Q_seq = jax.random.normal(kq, (B, S, D_IN), jnp.float32)
    K_seq = jax.random.normal(kk, (B, S, D_IN), jnp.float32)
    V_seq = jax.random.normal(kv, (B, S, D_IN), jnp.float32)

    # 1) NRMS-style true self-attention: shared input -> fused-QKV-weight path.
    attn = SelfAttentionPallas(HEADS, HEAD_DIM, D_IN, seed=0, mask_right=False)
    out1 = jax.block_until_ready(attn(x, x, x))
    ref1 = reference(attn, x, x, x)
    assert out1.shape == (B, S, HEADS * HEAD_DIM)
    assert jnp.allclose(out1, ref1, atol=2e-2, rtol=2e-2), float(
        jnp.max(jnp.abs(out1 - ref1)))

    # 2) General path: distinct Q/K/V, mask_right=True, Q_len 'mul' masking.
    attn_m = SelfAttentionPallas(HEADS, HEAD_DIM, D_IN, seed=1, mask_right=True)
    Q_len = jnp.array([5, 8], dtype=jnp.int32)
    out2 = jax.block_until_ready(attn_m(Q_seq, K_seq, V_seq, Q_len=Q_len))
    ref2 = reference(attn_m, Q_seq, K_seq, V_seq, Q_len=Q_len)
    assert out2.shape == (B, S, HEADS * HEAD_DIM)
    assert jnp.allclose(out2, ref2, atol=2e-2, rtol=2e-2), float(
        jnp.max(jnp.abs(out2 - ref2)))

    # 3) Batch-blocked path: B=5 exercises TB>1 and a padded trailing block.
    B3 = 5
    x3 = jax.random.normal(kx2, (B3, S, D_IN), jnp.float32)
    out3 = jax.block_until_ready(attn(x3, x3, x3))
    ref3 = reference(attn, x3, x3, x3)
    assert out3.shape == (B3, S, HEADS * HEAD_DIM)
    assert jnp.allclose(out3, ref3, atol=2e-2, rtol=2e-2), float(
        jnp.max(jnp.abs(out3 - ref3)))

    print("KERNEL_OK")
</pallas_src>

<mosaic_0001>
module attributes {stable_mosaic.version = 11 : i64} {
  func.func @_mhsa_shared_kernel(%arg0: i32, %arg1: memref<1x8x32xf32, #tpu.memory_space<vmem>>, %arg2: memref<32x96xbf16, #tpu.memory_space<vmem>>, %arg3: memref<1x96xf32, #tpu.memory_space<vmem>>, %arg4: memref<1x8x32xf32, #tpu.memory_space<vmem>>) attributes {dimension_semantics = [#tpu.dimension_semantics<parallel>], iteration_bounds = array<i64: 2>, scalar_prefetch = 0 : i64, scratch_operands = 0 : i64, tpu.core_type = #tpu.core_type<tc>, window_params = [{transform_indices = @transform_0, window_bounds = array<i64: 1, 8, 32>}, {pipeline_mode = #tpu.pipeline_mode<synchronous>, transform_indices = @transform_1, window_bounds = array<i64: 32, 96>}, {pipeline_mode = #tpu.pipeline_mode<synchronous>, transform_indices = @transform_2, window_bounds = array<i64: 1, 96>}, {transform_indices = @transform_3, window_bounds = array<i64: 1, 8, 32>}]} {
    %c0 = arith.constant 0 : index
    %c0_0 = arith.constant 0 : index
    %c0_1 = arith.constant 0 : index
    %0 = vector.load %arg1[%c0, %c0_0, %c0_1] : memref<1x8x32xf32, #tpu.memory_space<vmem>>, vector<1x8x32xf32>
    %1 = vector.shape_cast %0 : vector<1x8x32xf32> to vector<8x32xf32>
    %2 = arith.truncf %1 : vector<8x32xf32> to vector<8x32xbf16>
    %c0_2 = arith.constant 0 : index
    %c0_3 = arith.constant 0 : index
    %3 = vector.load %arg2[%c0_2, %c0_3] : memref<32x96xbf16, #tpu.memory_space<vmem>>, vector<32x96xbf16>
    %cst = arith.constant dense<0.000000e+00> : vector<8x96xf32>
    %4 = tpu.matmul %2, %3, %cst {dimension_numbers = #tpu.dot_dimension_numbers<[1], [0], [0], [1], [0, 0, 1, 1], [], []>} : vector<8x32xbf16>, vector<32x96xbf16>, vector<8x96xf32> -> vector<8x96xf32>
    %c0_4 = arith.constant 0 : index
    %c0_5 = arith.constant 0 : index
    %5 = vector.load %arg3[%c0_4, %c0_5] : memref<1x96xf32, #tpu.memory_space<vmem>>, vector<1x96xf32>
    %6 = vector.broadcast %5 : vector<1x96xf32> to vector<8x96xf32>
    %7 = arith.addf %4, %6 : vector<8x96xf32>
    %8 = vector.shape_cast %7 : vector<8x96xf32> to vector<1x8x96xf32>
    %9 = vector.extract_strided_slice %8 {offsets = [0, 0, 0], sizes = [1, 8, 32], strides = [1, 1, 1]} : vector<1x8x96xf32> to vector<1x8x32xf32>
    %10 = vector.extract_strided_slice %8 {offsets = [0, 0, 32], sizes = [1, 8, 32], strides = [1, 1, 1]} : vector<1x8x96xf32> to vector<1x8x32xf32>
    %11 = vector.extract_strided_slice %8 {offsets = [0, 0, 64], sizes = [1, 8, 32], strides = [1, 1, 1]} : vector<1x8x96xf32> to vector<1x8x32xf32>
    %12 = vector.extract_strided_slice %9 {offsets = [0, 0, 0], sizes = [1, 8, 8], strides = [1, 1, 1]} : vector<1x8x32xf32> to vector<1x8x8xf32>
    %13 = vector.extract_strided_slice %10 {offsets = [0, 0, 0], sizes = [1, 8, 8], strides = [1, 1, 1]} : vector<1x8x32xf32> to vector<1x8x8xf32>
    "tpu.trace_start"() <{level = 10 : i32, message = "bqd,bkd->bqk"}> : () -> ()
    %cst_6 = arith.constant dense<0.000000e+00> : vector<1x8x8xf32>
    %14 = tpu.matmul %12, %13, %cst_6 {dimension_numbers = #tpu.dot_dimension_numbers<[2], [2], [1], [1], [0, 0, 0, 1, 1, 1], [0], [0]>} : vector<1x8x8xf32>, vector<1x8x8xf32>, vector<1x8x8xf32> -> vector<1x8x8xf32>
    "tpu.trace_stop"() : () -> ()
    %cst_7 = arith.constant dense<0xFF800000> : vector<1x8xf32>
    %15 = vector.multi_reduction <maximumf>, %14, %cst_7 [2] : vector<1x8x8xf32> to vector<1x8xf32>
    %16 = vector.shape_cast %15 : vector<1x8xf32> to vector<1x8x1xf32>
    %17 = vector.broadcast %16 : vector<1x8x1xf32> to vector<1x8x8xf32>
    %18 = arith.subf %14, %17 : vector<1x8x8xf32>
    %19 = math.exp %18 : vector<1x8x8xf32>
    %cst_8 = arith.constant dense<0.000000e+00> : vector<1x8xf32>
    %20 = vector.multi_reduction <add>, %19, %cst_8 [2] : vector<1x8x8xf32> to vector<1x8xf32>
    %21 = vector.shape_cast %20 : vector<1x8xf32> to vector<1x8x1xf32>
    %22 = tpu.reciprocal %21 {approx = true} : vector<1x8x1xf32> -> vector<1x8x1xf32>
    %23 = vector.broadcast %22 : vector<1x8x1xf32> to vector<1x8x8xf32>
    %24 = arith.mulf %19, %23 : vector<1x8x8xf32>
    %25 = vector.extract_strided_slice %11 {offsets = [0, 0, 0], sizes = [1, 8, 8], strides = [1, 1, 1]} : vector<1x8x32xf32> to vector<1x8x8xf32>
    "tpu.trace_start"() <{level = 10 : i32, message = "bqk,bkd->bqd"}> : () -> ()
    %cst_9 = arith.constant dense<0.000000e+00> : vector<1x8x8xf32>
    %26 = tpu.matmul %24, %25, %cst_9 {dimension_numbers = #tpu.dot_dimension_numbers<[2], [1], [1], [2], [0, 0, 0, 1, 1, 2], [0], [0]>} : vector<1x8x8xf32>, vector<1x8x8xf32>, vector<1x8x8xf32> -> vector<1x8x8xf32>
    "tpu.trace_stop"() : () -> ()
    %c0_10 = arith.constant 0 : index
    %c0_11 = arith.constant 0 : index
    %c0_12 = arith.constant 0 : index
    %27 = vector.load %arg4[%c0_10, %c0_11, %c0_12] : memref<1x8x32xf32, #tpu.memory_space<vmem>>, vector<1x8x8xf32>
    tpu.vector_store %arg4[%c0_10, %c0_11, %c0_12], %26 {strides = array<i32>} : memref<1x8x32xf32, #tpu.memory_space<vmem>>, vector<1x8x8xf32>,
    %28 = vector.extract_strided_slice %9 {offsets = [0, 0, 8], sizes = [1, 8, 8], strides = [1, 1, 1]} : vector<1x8x32xf32> to vector<1x8x8xf32>
    %29 = vector.extract_strided_slice %10 {offsets = [0, 0, 8], sizes = [1, 8, 8], strides = [1, 1, 1]} : vector<1x8x32xf32> to vector<1x8x8xf32>
    "tpu.trace_start"() <{level = 10 : i32, message = "bqd,bkd->bqk"}> : () -> ()
    %cst_13 = arith.constant dense<0.000000e+00> : vector<1x8x8xf32>
    %30 = tpu.matmul %28, %29, %cst_13 {dimension_numbers = #tpu.dot_dimension_numbers<[2], [2], [1], [1], [0, 0, 0, 1, 1, 1], [0], [0]>} : vector<1x8x8xf32>, vector<1x8x8xf32>, vector<1x8x8xf32> -> vector<1x8x8xf32>
    "tpu.trace_stop"() : () -> ()
    %cst_14 = arith.constant dense<0xFF800000> : vector<1x8xf32>
    %31 = vector.multi_reduction <maximumf>, %30, %cst_14 [2] : vector<1x8x8xf32> to vector<1x8xf32>
    %32 = vector.shape_cast %31 : vector<1x8xf32> to vector<1x8x1xf32>
    %33 = vector.broadcast %32 : vector<1x8x1xf32> to vector<1x8x8xf32>
    %34 = arith.subf %30, %33 : vector<1x8x8xf32>
    %35 = math.exp %34 : vector<1x8x8xf32>
    %cst_15 = arith.constant dense<0.000000e+00> : vector<1x8xf32>
    %36 = vector.multi_reduction <add>, %35, %cst_15 [2] : vector<1x8x8xf32> to vector<1x8xf32>
    %37 = vector.shape_cast %36 : vector<1x8xf32> to vector<1x8x1xf32>
    %38 = tpu.reciprocal %37 {approx = true} : vector<1x8x1xf32> -> vector<1x8x1xf32>
    %39 = vector.broadcast %38 : vector<1x8x1xf32> to vector<1x8x8xf32>
    %40 = arith.mulf %35, %39 : vector<1x8x8xf32>
    %41 = vector.extract_strided_slice %11 {offsets = [0, 0, 8], sizes = [1, 8, 8], strides = [1, 1, 1]} : vector<1x8x32xf32> to vector<1x8x8xf32>
    "tpu.trace_start"() <{level = 10 : i32, message = "bqk,bkd->bqd"}> : () -> ()
    %cst_16 = arith.constant dense<0.000000e+00> : vector<1x8x8xf32>
    %42 = tpu.matmul %40, %41, %cst_16 {dimension_numbers = #tpu.dot_dimension_numbers<[2], [1], [1], [2], [0, 0, 0, 1, 1, 2], [0], [0]>} : vector<1x8x8xf32>, vector<1x8x8xf32>, vector<1x8x8xf32> -> vector<1x8x8xf32>
    "tpu.trace_stop"() : () -> ()
    %c0_17 = arith.constant 0 : index
    %c0_18 = arith.constant 0 : index
    %c8 = arith.constant 8 : index
    %43 = vector.load %arg4[%c0_17, %c0_18, %c8] : memref<1x8x32xf32, #tpu.memory_space<vmem>>, vector<1x8x8xf32>
    tpu.vector_store %arg4[%c0_17, %c0_18, %c8], %42 {strides = array<i32>} : memref<1x8x32xf32, #tpu.memory_space<vmem>>, vector<1x8x8xf32>,
    %44 = vector.extract_strided_slice %9 {offsets = [0, 0, 16], sizes = [1, 8, 8], strides = [1, 1, 1]} : vector<1x8x32xf32> to vector<1x8x8xf32>
    %45 = vector.extract_strided_slice %10 {offsets = [0, 0, 16], sizes = [1, 8, 8], strides = [1, 1, 1]} : vector<1x8x32xf32> to vector<1x8x8xf32>
    "tpu.trace_start"() <{level = 10 : i32, message = "bqd,bkd->bqk"}> : () -> ()
    %cst_19 = arith.constant dense<0.000000e+00> : vector<1x8x8xf32>
    %46 = tpu.matmul %44, %45, %cst_19 {dimension_numbers = #tpu.dot_dimension_numbers<[2], [2], [1], [1], [0, 0, 0, 1, 1, 1], [0], [0]>} : vector<1x8x8xf32>, vector<1x8x8xf32>, vector<1x8x8xf32> -> vector<1x8x8xf32>
    "tpu.trace_stop"() : () -> ()
    %cst_20 = arith.constant dense<0xFF800000> : vector<1x8xf32>
    %47 = vector.multi_reduction <maximumf>, %46, %cst_20 [2] : vector<1x8x8xf32> to vector<1x8xf32>
    %48 = vector.shape_cast %47 : vector<1x8xf32> to vector<1x8x1xf32>
    %49 = vector.broadcast %48 : vector<1x8x1xf32> to vector<1x8x8xf32>
    %50 = arith.subf %46, %49 : vector<1x8x8xf32>
    %51 = math.exp %50 : vector<1x8x8xf32>
    %cst_21 = arith.constant dense<0.000000e+00> : vector<1x8xf32>
    %52 = vector.multi_reduction <add>, %51, %cst_21 [2] : vector<1x8x8xf32> to vector<1x8xf32>
    %53 = vector.shape_cast %52 : vector<1x8xf32> to vector<1x8x1xf32>
    %54 = tpu.reciprocal %53 {approx = true} : vector<1x8x1xf32> -> vector<1x8x1xf32>
    %55 = vector.broadcast %54 : vector<1x8x1xf32> to vector<1x8x8xf32>
    %56 = arith.mulf %51, %55 : vector<1x8x8xf32>
    %57 = vector.extract_strided_slice %11 {offsets = [0, 0, 16], sizes = [1, 8, 8], strides = [1, 1, 1]} : vector<1x8x32xf32> to vector<1x8x8xf32>
    "tpu.trace_start"() <{level = 10 : i32, message = "bqk,bkd->bqd"}> : () -> ()
    %cst_22 = arith.constant dense<0.000000e+00> : vector<1x8x8xf32>
    %58 = tpu.matmul %56, %57, %cst_22 {dimension_numbers = #tpu.dot_dimension_numbers<[2], [1], [1], [2], [0, 0, 0, 1, 1, 2], [0], [0]>} : vector<1x8x8xf32>, vector<1x8x8xf32>, vector<1x8x8xf32> -> vector<1x8x8xf32>
    "tpu.trace_stop"() : () -> ()
    %c0_23 = arith.constant 0 : index
    %c0_24 = arith.constant 0 : index
    %c16 = arith.constant 16 : index
    %59 = vector.load %arg4[%c0_23, %c0_24, %c16] : memref<1x8x32xf32, #tpu.memory_space<vmem>>, vector<1x8x8xf32>
    tpu.vector_store %arg4[%c0_23, %c0_24, %c16], %58 {strides = array<i32>} : memref<1x8x32xf32, #tpu.memory_space<vmem>>, vector<1x8x8xf32>,
    %60 = vector.extract_strided_slice %9 {offsets = [0, 0, 24], sizes = [1, 8, 8], strides = [1, 1, 1]} : vector<1x8x32xf32> to vector<1x8x8xf32>
    %61 = vector.extract_strided_slice %10 {offsets = [0, 0, 24], sizes = [1, 8, 8], strides = [1, 1, 1]} : vector<1x8x32xf32> to vector<1x8x8xf32>
    "tpu.trace_start"() <{level = 10 : i32, message = "bqd,bkd->bqk"}> : () -> ()
    %cst_25 = arith.constant dense<0.000000e+00> : vector<1x8x8xf32>
    %62 = tpu.matmul %60, %61, %cst_25 {dimension_numbers = #tpu.dot_dimension_numbers<[2], [2], [1], [1], [0, 0, 0, 1, 1, 1], [0], [0]>} : vector<1x8x8xf32>, vector<1x8x8xf32>, vector<1x8x8xf32> -> vector<1x8x8xf32>
    "tpu.trace_stop"() : () -> ()
    %cst_26 = arith.constant dense<0xFF800000> : vector<1x8xf32>
    %63 = vector.multi_reduction <maximumf>, %62, %cst_26 [2] : vector<1x8x8xf32> to vector<1x8xf32>
    %64 = vector.shape_cast %63 : vector<1x8xf32> to vector<1x8x1xf32>
    %65 = vector.broadcast %64 : vector<1x8x1xf32> to vector<1x8x8xf32>
    %66 = arith.subf %62, %65 : vector<1x8x8xf32>
    %67 = math.exp %66 : vector<1x8x8xf32>
    %cst_27 = arith.constant dense<0.000000e+00> : vector<1x8xf32>
    %68 = vector.multi_reduction <add>, %67, %cst_27 [2] : vector<1x8x8xf32> to vector<1x8xf32>
    %69 = vector.shape_cast %68 : vector<1x8xf32> to vector<1x8x1xf32>
    %70 = tpu.reciprocal %69 {approx = true} : vector<1x8x1xf32> -> vector<1x8x1xf32>
    %71 = vector.broadcast %70 : vector<1x8x1xf32> to vector<1x8x8xf32>
    %72 = arith.mulf %67, %71 : vector<1x8x8xf32>
    %73 = vector.extract_strided_slice %11 {offsets = [0, 0, 24], sizes = [1, 8, 8], strides = [1, 1, 1]} : vector<1x8x32xf32> to vector<1x8x8xf32>
    "tpu.trace_start"() <{level = 10 : i32, message = "bqk,bkd->bqd"}> : () -> ()
    %cst_28 = arith.constant dense<0.000000e+00> : vector<1x8x8xf32>
    %74 = tpu.matmul %72, %73, %cst_28 {dimension_numbers = #tpu.dot_dimension_numbers<[2], [1], [1], [2], [0, 0, 0, 1, 1, 2], [0], [0]>} : vector<1x8x8xf32>, vector<1x8x8xf32>, vector<1x8x8xf32> -> vector<1x8x8xf32>
    "tpu.trace_stop"() : () -> ()
    %c0_29 = arith.constant 0 : index
    %c0_30 = arith.constant 0 : index
    %c24 = arith.constant 24 : index
    %75 = vector.load %arg4[%c0_29, %c0_30, %c24] : memref<1x8x32xf32, #tpu.memory_space<vmem>>, vector<1x8x8xf32>
    tpu.vector_store %arg4[%c0_29, %c0_30, %c24], %74 {strides = array<i32>} : memref<1x8x32xf32, #tpu.memory_space<vmem>>, vector<1x8x8xf32>,
    return
  }
  func.func @transform_0(%arg0: i32) -> (i32, i32, i32) {
    %c0_i32 = arith.constant 0 : i32
    %c0_i32_0 = arith.constant 0 : i32
    %c0_i32_1 = arith.constant 0 : i32
    return %arg0, %c0_i32, %c0_i32_0 : i32, i32, i32
  }
  func.func @transform_1(%arg0: i32) -> (i32, i32) {
    %c0_i32 = arith.constant 0 : i32
    %c0_i32_0 = arith.constant 0 : i32
    %c0_i32_1 = arith.constant 0 : i32
    return %c0_i32, %c0_i32_0 : i32, i32
  }
  func.func @transform_2(%arg0: i32) -> (i32, i32) {
    %c0_i32 = arith.constant 0 : i32
    %c0_i32_0 = arith.constant 0 : i32
    %c0_i32_1 = arith.constant 0 : i32
    return %c0_i32, %c0_i32_0 : i32, i32
  }
  func.func @transform_3(%arg0: i32) -> (i32, i32, i32) {
    %c0_i32 = arith.constant 0 : i32
    %c0_i32_0 = arith.constant 0 : i32
    %c0_i32_1 = arith.constant 0 : i32
    return %arg0, %c0_i32, %c0_i32_0 : i32, i32, i32
  }
}

</mosaic_0001>

<bundles_post_ra>
// kernel: tpu_custom_call.1
= control target key start
LH: loop header
LB: loop body
LE: loop exit
PB: predicated region body
PF: predicated region fallthrough
CT: control target
= control target key end

     0   :  { %8 = vsyncpa [#allocation3], 0  ;;  %s1678_s0 = inlined_call_operand.hbm [shape: f32[2,8,32], index: 0, kind: input, shape index: {}]   ;;  %s1679_s1 = inlined_call_operand.hbm [shape: bf16[32,96], index: 1, kind: input, shape index: {}]   ;;  %s1680_s2 = inlined_call_operand.vmem [shape: f32[1,96], index: 2, kind: input, shape index: {}]   ;;  %s1681_s3 = inlined_call_operand.hbm [shape: f32[2,8,32], index: 3, kind: output, shape index: {}]  }
   0x1   :  { %10 = vsyncpa [#allocation3 + $0x1], 0 }
   0x2   :  { %11 = vsyncpa [#allocation6], 0 }
   0x3   :  { %12 = vsyncpa [#allocation4], 0 }
   0x4   :  { %14 = vsyncpa [#allocation4 + $0x1], 0  ;;  %s1405_s12 = smov 0   ;;  %s1407_s13 = smov 0  }
   0x5   :  { %s1409_s14 = smov 0   ;;  %s1411_s15 = smov 0  }
   0x6 LB: > { %s1426_s16 = sadd.s32 4294967295, %s1362_s15   ;;  %s1044_s17 = sadd.s32 4294967294, %s1362_s15   ;;  %s1362_s15 = sphi %s1411_s15, %s1701_s15   ;;  %s1358_s14 = sphi %s1409_s14, %s1700_s14   ;;  %s1354_s13 = sphi %s1407_s13, %s1699_s13   ;;  %s1350_s12 = sphi %s1405_s12, %s1698_s12  }
   0x7   : > { %p40_p0 = scmp.ne.s32.totalorder %s1354_s13, %s1350_s12  ;;  %p1682_p1 = scmp.eq.s32.totalorder %s1426_s16, 0 }
   0x8   : > { %p112_p3 = scmp.eq.s32.totalorder %s1044_s17, 1  ;;  %p1045_p5 = scmp.ge.s32.totalorder %s1362_s15, 1 }
   0x9   : > { %p1435_p4 = por %p1682_p1, %p40_p0  ;;  %p119_p7 = scmp.lt.s32.totalorder %s1362_s15, 3 }
   0xa   : > { %p1440_p6 = por %p112_p3, %p40_p0  ;;  %s1364_s21 = smov [#allocation5]  }
   0xb   : > { %s1685_s18 = scalar_select %p1435_p4, 1, 0 }
   0xc   : > { %s1686_s19 = scalar_select %p1440_p6, 1, 0 }
   0xd   : > { %p1445_p8 = pnand %p1045_p5, %p119_p7  ;;  %s131_s22 = sshll.u32 %s1364_s21, 4  ;;  %s1449_s22 = int_to_ptr.vmem [resolvable:$true] %s131_s22 }
   0xe   : > { %s1461_s24 = sadd.s32 1, %s1362_s15   ;;  %s27_s25 = sadd.s32 1, %s1358_s14 }
   0xf   : > { %s1687_s20 = scalar_select %p1445_p8, 1, 0 }
  0x10   : > { %p1149_p9 = pneg %p1445_p8  ;;  %s24_s26 = ssub.s32 %s1362_s15, %s1461_s24 }
  0x11   : > { %s1234_s29 = scalar_lea.hbm %s1679_s1, 256 }
  0x12   : > { %p1456_p11 = pnand %p1149_p9, %p1682_p1  ;;  %p1235_p12 = scmp.ne.s32.totalorder %s1679_s1, %s1234_s29 }
  0x13   : > { %p1241_p5 = scmp.lt.u32.totalorder %s1234_s29, %s1679_s1 }
  0x14   : > { %p1236_p13 = pneg %p1456_p11 }
  0x16   : > { %p1237_p0 = pnand %p1236_p13, %p1235_p12 }
  0x18   : > { %p1238_p3 = pneg %p1237_p0 }
  0x1a   : > { %p1243_p7 = pnand %p1241_p5, %p1238_p3 }
  0x1c   : > { %1246 = shalt.err (!%p1243_p7)
}
  0x1d   : > { %s1247_s7 = scalar_lea.vmem %s1449_s22, 256  ;;  %p1255_p2 = scmp.lt.s32.totalorder %s1449_s22, %s1449_s22 }
  0x1e   : > { %p1248_p9 = scmp.ne.s32.totalorder %s1449_s22, %s1247_s7  ;;  %p1256_p6 = scmp.lt.s32.totalorder %s1247_s7, %s1247_s7 }
  0x20   : > { %p1250_p10 = pnand %p1248_p9, %p1236_p13  ;;  %p1257_p4 = por %p1256_p6, %p1255_p2 }
  0x22   : > { %p1251_p1 = pneg %p1250_p10 }
  0x24   : > { %p1258_p8 = pnand %p1257_p4, %p1251_p1 }
  0x26   : > { %1261 = shalt.err (!%p1258_p8)
}
  0x27   : > { %s1365_s8 = smov 64   ;;  %s1366_s9 = smov 4  }
  0x28   : > { %1152 = dma.hbm_to_vmem [thread:$0]  (!%p1456_p11), %s1679_s1, 256, %s1449_s22, [#allocation6], %s1365_s8, %s1365_s8, %s1366_s9  }
  0x29   : > { %p25_p2 = scmp.eq.s32.totalorder %s24_s26, 0  ;;  %p34_p1 = scmp.ne.s32.totalorder %s1358_s14, %s1354_s13 }
  0x2a   : > { %p35_p4 = scmp.eq.s32.totalorder %s1362_s15, 0  ;;  %p1162_p6 = scmp.lt.s32.totalorder %s1362_s15, 2 }
  0x2b   : > { %s1492_s17 = scalar_select %p25_p2, %s1358_s14, %s27_s25  }
  0x2c   : > { %p36_p8 = por %p35_p4, %p34_p1  ;;  %p1689_p10 = scmp.eq.s32.totalorder %s1426_s16, 1 }
  0x2d   : > { %s148_s27 = sand.u32 1, %s1358_s14   ;;  %s1049_s28 = sshll.u32 %s1362_s15, 7 }
  0x2e   : > { %p1496_p12 = por %p1689_p10, %p34_p1  ;;  %s1048_s29 = sshll.u32 %s148_s27, 3 }
  0x2f   : > { %s1505_s4 = scalar_lea.hbm %s1678_s0, %s1049_s28  ;;  %s152_s22 = scalar_lea.vmem [#allocation2], %s1048_s29 }
  0x30   : > { %s159_s25 = sshll.u32 %s152_s22, 4  ;;  %p1507_p11 = pnand %p1162_p6, %p36_p8  ;;  %s1511_s25 = int_to_ptr.vmem [resolvable:$true] %s159_s25 }
  0x31   : > { %s149_s5 = scalar_lea.sflag [#allocation3], %s148_s27  ;;  %s1262_s6 = scalar_lea.hbm %s1505_s4, 128 }
  0x32   : > { %p1263_p13 = scmp.ne.s32.totalorder %s1505_s4, %s1262_s6  ;;  %p1264_p0 = pneg %p1507_p11 }
  0x33   : > { %s1267_s9 = scalar_lea.hbm %s1678_s0, 256  ;;  %p1268_p7 = scmp.lt.u32.totalorder %s1505_s4, %s1678_s0 }
  0x34   : > { %p1265_p3 = pnand %p1264_p0, %p1263_p13  ;;  %p1269_p9 = scmp.lt.u32.totalorder %s1267_s9, %s1262_s6 }
  0x35   : > { %p1271_p1 = scmp.lt.u32.totalorder %s1262_s6, %s1505_s4 }
  0x36   : > { %p1266_p5 = pneg %p1265_p3  ;;  %p1270_p2 = por %p1269_p9, %p1268_p7 }
  0x38   : > { %p1272_p4 = por %p1271_p1, %p1270_p2 }
  0x3a   : > { %p1273_p6 = pnand %p1272_p4, %p1266_p5 }
  0x3c   : > { %1276 = shalt.err (!%p1273_p6)
}
  0x3d   : > { %s1277_s27 = scalar_lea.vmem %s1511_s25, 128  ;;  %s1367_s28 = smov [#allocation2]  }
  0x3e   : > { %p1278_p8 = scmp.ne.s32.totalorder %s1511_s25, %s1277_s27  ;;  %s1282_s29 = sshll.u32 %s1367_s28, 4  ;;  %s1283_s29 = int_to_ptr.vmem [resolvable:$false] %s1282_s29 }
  0x3f   : > { %s1284_s23 = scalar_lea.vmem %s1283_s29, 256  ;;  %p1285_p3 = scmp.lt.s32.totalorder %s1511_s25, %s1283_s29 }
  0x40   : > { %p1280_p10 = pnand %p1278_p8, %p1264_p0  ;;  %p1286_p7 = scmp.lt.s32.totalorder %s1284_s23, %s1277_s27 }
  0x42   : > { %p1281_p13 = pneg %p1280_p10  ;;  %p1287_p9 = por %p1286_p7, %p1285_p3 }
  0x44   : > { %p1288_p2 = pnand %p1287_p9, %p1281_p13 }
  0x46   : > { %1291 = shalt.err (!%p1288_p2)
}
  0x47   : > { %1156 = dma.hbm_to_vmem [thread:$0]  (!%p1507_p11), %s1505_s4, 128, %s1511_s25, %s149_s5  }
  0x48   : > { %p1692_p5 = scmp.ne.s32.totalorder %s1687_s20, 0 }
  0x49   : > { %s1541_s30 = sand.u32 (!%p1692_p5), 1, %s1354_s13   ;;  %p1693_p0 = scmp.ne.s32.totalorder (!%p1692_p5), %s1685_s18, 0 }
  0x4a   : > { %168 = sbr.rel (%p1692_p5) target bundleno = 1832 (0x728), region = 32  ;;  %s1051_s22 = sshll.u32 (!%p1692_p5), %s1541_s30, 3 }
  0x4b   : > { %s171_s6 = scalar_lea.sflag (!%p1692_p5), [#allocation3], %s1541_s30  ;;  %s174_s7 = scalar_lea.vmem (!%p1692_p5), [#allocation2], %s1051_s22 }
  0x51   : > { %1337 = dma.done.wait (%p1693_p0), %s171_s6, 128  }
  0x52   : > { %1339 = vsyncadd (%p1693_p0), %s171_s6, 4294967168  ;;  %p1694_p11 = scmp.eq.s32.totalorder %s1426_s16, 0 }
  0x54   : > { %1341 = dma.done.wait (%p1694_p11), [#allocation6], 256   ;;  %p1695_p1 = pmov %p1694_p11 }
  0x55   : > { %v1368_v0 = vmov 0.0   ;;  %vm1369_vm0 = vmmov 0   ;;  %v1216_v1 = vld [vmem:[#allocation5] sm:$0xff]   ;;  %v1217_v2 = vld [vmem:[#allocation5 + $0x8] sm:$0xff]   ;;  %v202_v3 = vld [vmem:[%s174_s7] sm:$0xff]  ;;  %vm227_vm1 = vcmask 261120  }
  0x56   : > { %1343 = vsyncadd (%p1695_p1), [#allocation6], 4294967040  ;;  %1093 = vmatprep.subr.bf16.mxu0 %v1368_v0  ;;  %1097 = vmatprep.mubr.msk.bf16.mxu0 %vm1369_vm0, %v1368_v0  ;;  %v203_v4 = vpack.c.bf16 %v202_v3, %v202_v3  ;;  %v1054_v5 = vld [vmem:[%s1680_s2] ss:$0 sm:$0xff]  ;;  %s1370_s4 = smov 64   ;;  %s1371_s25 = smov 96  }
  0x57   : > { %1101 = vmatprep.subr.mxu1 %v1368_v0  ;;  %1103 = vmatprep.mubr.msk.f32.mxu1 %vm1369_vm0, %v1368_v0  ;;  %s1372_s26 = smov 88   ;;  %s1373_s5 = smov 120   ;;  %vm274_vm2 = vcmask 64512   ;;  %vm606_vm3 = vcmask 130112   ;;  %vm777_vm4 = vcmask 195712   ;;  %vm948_vm5 = vcmask 261312  }
  0x58   : > { %1094 = vmatpush3.bf16.msra.mxu0 %v1216_v1  ;;  %s1374_s8 = smov 80   ;;  %s1375_s9 = smov 72  }
  0x59   : > { %1095 = vmatprep.subr.bf16.mxu0 %v1368_v0  ;;  %s1376_s10 = smov 112   ;;  %s1377_s11 = smov 104  }
  0x5a   : > { %s1604_s27 = scalar_lea.vmem [#allocation7], %s1051_s22  ;;  %s1378_s28 = smov 56  }
  0x5b   : > { %s1379_s29 = smov 40   ;;  %s1380_s23 = smov 48  }
  0x5c   : > { %1096 = vmatpush3.bf16.msra.mxu0 %v1217_v2  ;;  %s1381_s22 = smov 8   ;;  %s1382_s6 = smov 16  }
  0x5d   : > { %1116 = vmatprep.subr.mxu0 %v1368_v0  ;;  %s1383_s7 = smov 24   ;;  %s1071_s18 = sshll.u32 %s1426_s16, 7 }
  0x5e   : > { %s964_s20 = sshll.u32 %s1604_s27, 4  ;;  %s1384_s16 = smov [#allocation7]   ;;  %s1635_s20 = int_to_ptr.vmem [resolvable:$true] %s964_s20 }
  0x5f   : > { %1098 = vmatmul.mubr.msk.bf16.vlgmr.msra.gmra.mrb[0].mxu0 %vm227_vm1, %v203_v4 }
  0x60   : > { %1118 = vmatprep.mubr.msk.f32.mxu0 %vm1369_vm0, %v1368_v0 }
 0x132   : > { %v265_v6 = vpop.f32.mrb[0].mxu0 }
 0x133   : > { %v1568_v7 = vadd.f32 %v1054_v5, %v265_v6  ;;  %v1099_v8 = vpop.f32.mrb[1].mxu0 }
 0x134   : > { %v268_v9 = vpop.f32.mrb[2].mxu0 }
 0x135   : > { %360 = vrot.lane.b32.xlu1 %v1568_v7, %s1370_s4  ;;  %272 = vrot.lane.b32.xlu0 %v1568_v7, %s1371_s25  ;;  %v1100_v10 = vpop.f32.mrb[3].mxu0 }
 0x139   : > { %439 = vrot.lane.b32.xlu1 %v1568_v7, %s1372_s26  ;;  %s1633_s26 = scalar_lea.hbm %s1681_s3, %s1071_s18 }
 0x13d   : > { %437 = vrot.lane.b32.xlu1 %v1568_v7, %s1373_s5  ;;  %s951_s5 = scalar_lea.sflag [#allocation4], %s1541_s30 }
 0x141   : > { %610 = vrot.lane.b32.xlu1 %v1568_v7, %s1374_s8  ;;  %s1292_s8 = scalar_lea.vmem %s1635_s20, 128 }
 0x142   : > { %p1293_p4 = scmp.ne.s32.totalorder %s1635_s20, %s1292_s8 }
 0x144   : > { %p1294_p6 = pnand %p1293_p4, %p1496_p12 }
 0x146   : > { %p1295_p8 = pneg %p1294_p6 }
 0x1a7   : > { %v273_v11 = vpop.permute.xlu0 %272  ;;  %v361_v12 = vpop.permute.xlu1 %360 }
 0x1a8   : > { %1102 = vmatpush3.xpose.msk.msra.mxu1 %vm274_vm2, %v273_v11 }
 0x1a9   : > { %1106 = vmatprep.subr.mxu1 %v1368_v0 }
 0x1ab   : > { %1104 = vmatmul.mubr.msk.f32.vlgmr.msra.gmra.mrb[0].mxu1 %vm274_vm2, %v1568_v7  ;;  %v440_v21 = vpop.permute.xlu1 %439 }
 0x1ac   : > { %1107 = vmatpush3.msra.mxu1 %v361_v12  ;;  %1108 = vmatprep.mubr.msk.f32.mxu1 %vm1369_vm0, %v1368_v0 }
 0x1ad   : > { %1111 = vmatprep.subr.mxu1 %v1368_v0 }
 0x1af   : > { %v438_v22 = vpop.permute.xlu1 %437 }
 0x1b3   : > { %v611_v23 = vpop.permute.xlu1 %610 }
 0x27e   : > { %v345_v13 = vpop.f32.mrb[0].mxu1 }
 0x27f   : > { %v1105_v14 = vpop.f32.mrb[1].mxu1  ;;  %v349_v15 = vsel %vm274_vm2, %v345_v13, -inf }
 0x280   : > { %350 = vmax.xlane.f32.xlu0 %v349_v15 }
 0x296   : > { %781 = vrot.lane.b32.xlu0 %v1568_v7, %s1375_s9  ;;  %s1296_s9 = sshll.u32 %s1384_s16, 4  ;;  %s1297_s9 = int_to_ptr.vmem [resolvable:$false] %s1296_s9 }
 0x297   : > { %p1299_p10 = scmp.lt.s32.totalorder %s1635_s20, %s1297_s9 }
 0x30d   : > { %v351_v16 = vpop.xlane.xlu0 %350 }
 0x30e   : > { %v352_v17 = vsub.f32 %v345_v13, %v351_v16 }
 0x310   : > { %v353_v18 = vmul.f32 1.442695, %v352_v17 }
 0x311   : > { %v782_v28 = vpop.permute.xlu0 %781 }
 0x312   : > { %1218 = vpow2.f32 %v353_v18 }
 0x31c   : > { %v1219_v19 = vpop.eup %1218 }
 0x31d   : > { %v355_v20 = vsel %vm274_vm2, %v1219_v19, 0.0 }
 0x31e   : > { %356 = vadd.xlane.f32.xlu1 %v355_v20 }
 0x32f   : > { %608 = vrot.lane.b32.xlu1 %v1568_v7, %s1376_s10  ;;  %s1298_s10 = scalar_lea.vmem %s1297_s9, 256 }
 0x330   : > { %p1300_p13 = scmp.lt.s32.totalorder %s1298_s10, %s1292_s8 }
 0x332   : > { %p1301_p3 = por %p1300_p13, %p1299_p10 }
 0x333   : > { %779 = vrot.lane.b32.xlu1 %v1568_v7, %s1377_s11 }
 0x334   : > { %p1302_p7 = pnand %p1301_p3, %p1295_p8 }
 0x3ab   : > { %v357_v24 = vpop.xlane.xlu1 %356 }
 0x3ac   : > { %1220 = vrcp.f32 %v357_v24 }
 0x3af   : > { %v609_v27 = vpop.permute.xlu1 %608 }
 0x3b3   : > { %v780_v29 = vpop.permute.xlu1 %779 }
 0x3b6   : > { %v1221_v25 = vpop.eup %1220 }
 0x3b7   : > { %v359_v26 = vmul.f32 %v1221_v25, %v1219_v19 }
 0x3b9   : > { %1109 = vmatmul.mubr.msk.f32.vlgmr.msra.gmra.mrb[2].mxu1 %vm274_vm2, %v359_v26 }
 0x3ba   : > { %1112 = vmatpush3.xpose.msk.msra.mxu1 %vm274_vm2, %v440_v21  ;;  %1113 = vmatprep.mubr.msk.f32.mxu1 %vm1369_vm0, %v1368_v0 }
 0x3bb   : > { %1121 = vmatprep.subr.mxu1 %v1368_v0 }
 0x3bd   : > { %1114 = vmatmul.mubr.msk.f32.vlgmr.msra.gmra.mrb[4].mxu1 %vm274_vm2, %v438_v22 }
 0x3be   : > { %1122 = vmatpush3.xpose.msk.msra.mxu1 %vm274_vm2, %v611_v23  ;;  %1123 = vmatprep.mubr.msk.f32.mxu1 %vm1369_vm0, %v1368_v0 }
 0x3bf   : > { %1131 = vmatprep.subr.mxu1 %v1368_v0 }
 0x3c1   : > { %1124 = vmatmul.mubr.msk.f32.vlgmr.msra.gmra.mrb[6].mxu1 %vm274_vm2, %v609_v27 }
 0x3c2   : > { %1132 = vmatpush3.xpose.msk.msra.mxu1 %vm274_vm2, %v782_v28  ;;  %1133 = vmatprep.mubr.msk.f32.mxu1 %vm1369_vm0, %v1368_v0 }
 0x3c5   : > { %1134 = vmatmul.mubr.msk.f32.vlgmr.msra.gmra.mrb[8].mxu1 %vm274_vm2, %v780_v29 }
 0x48c   : > { %v432_v30 = vpop.f32.mrb[2].mxu1 }
 0x48d   : > { %436 = vst.msk [vmem:[%s1604_s27] sm:$0xff] %vm274_vm2, %v432_v30  ;;  %v1110_v31 = vpop.f32.mrb[3].mxu1 }
 0x490   : > { %v511_v32 = vpop.f32.mrb[4].mxu1 }
 0x491   : > { %v1115_v33 = vpop.f32.mrb[5].mxu1  ;;  %v515_v34 = vsel %vm274_vm2, %v511_v32, -inf }
 0x492   : > { %516 = vmax.xlane.f32.xlu1 %v515_v34 }
 0x494   : > { %v682_v35 = vpop.f32.mrb[6].mxu1 }
 0x495   : > { %v1125_v36 = vpop.f32.mrb[7].mxu1  ;;  %v686_v37 = vsel %vm274_vm2, %v682_v35, -inf }
 0x496   : > { %687 = vmax.xlane.f32.xlu0 %v686_v37 }
 0x498   : > { %v853_v38 = vpop.f32.mrb[8].mxu1 }
 0x499   : > { %v1135_v39 = vpop.f32.mrb[9].mxu1  ;;  %v857_v40 = vsel %vm274_vm2, %v853_v38, -inf }
 0x49a   : > { %858 = vmax.xlane.f32.xlu1 %v857_v40 }
 0x4ab   : > { %526 = vrot.lane.b32.xlu1 %v1568_v7, %s1378_s28 }
 0x51f   : > { %v517_v41 = vpop.xlane.xlu1 %516 }
 0x520   : > { %v518_v42 = vsub.f32 %v511_v32, %v517_v41 }
 0x522   : > { %v519_v43 = vmul.f32 1.442695, %v518_v42 }
 0x523   : > { %v688_v44 = vpop.xlane.xlu0 %687 }
 0x524   : > { %1222 = vpow2.f32 %v519_v43  ;;  %v689_v45 = vsub.f32 %v682_v35, %v688_v44 }
 0x526   : > { %v690_v46 = vmul.f32 1.442695, %v689_v45 }
 0x527   : > { %v859_v47 = vpop.xlane.xlu1 %858 }
 0x528   : > { %1224 = vpow2.f32 %v690_v46  ;;  %v860_v48 = vsub.f32 %v853_v38, %v859_v47 }
 0x52a   : > { %v861_v49 = vmul.f32 1.442695, %v860_v48 }
 0x52b   : > { %v527_v50 = vpop.permute.xlu1 %526 }
 0x52c   : > { %1226 = vpow2.f32 %v861_v49  ;;  %1117 = vmatpush3.msra.mxu0 %v527_v50 }
 0x52d   : > { %1126 = vmatprep.subr.mxu0 %v1368_v0 }
 0x52e   : > { %v1223_v51 = vpop.eup %1222 }
 0x52f   : > { %v521_v52 = vsel %vm274_vm2, %v1223_v51, 0.0 }
 0x530   : > { %522 = vadd.xlane.f32.xlu1 %v521_v52 }
 0x532   : > { %v1225_v53 = vpop.eup %1224 }
 0x533   : > { %v692_v54 = vsel %vm274_vm2, %v1225_v53, 0.0 }
 0x534   : > { %693 = vadd.xlane.f32.xlu1 %v692_v54 }
 0x536   : > { %v1227_v55 = vpop.eup %1226 }
 0x537   : > { %v863_v56 = vsel %vm274_vm2, %v1227_v55, 0.0 }
 0x538   : > { %864 = vadd.xlane.f32.xlu0 %v863_v56 }
 0x545   : > { %868 = vrot.lane.b32.xlu1 %v1568_v7, %s1379_s29 }
 0x54e   : > { %697 = vrot.lane.b32.xlu0 %v1568_v7, %s1380_s23 }
 0x5bd   : > { %v523_v57 = vpop.xlane.xlu1 %522 }
 0x5be   : > { %1228 = vrcp.f32 %v523_v57 }
 0x5c1   : > { %v694_v58 = vpop.xlane.xlu1 %693 }
 0x5c2   : > { %1230 = vrcp.f32 %v694_v58 }
 0x5c5   : > { %v865_v59 = vpop.xlane.xlu0 %864  ;;  %v869_v2 = vpop.permute.xlu1 %868 }
 0x5c6   : > { %1232 = vrcp.f32 %v865_v59 }
 0x5c8   : > { %v1229_v60 = vpop.eup %1228 }
 0x5c9   : > { %v525_v61 = vmul.f32 %v1229_v60, %v1223_v51  ;;  %v698_v62 = vpop.permute.xlu0 %697 }
 0x5cb   : > { %1119 = vmatmul.mubr.msk.f32.vlgmr.msra.gmra.mrb[4].mxu0 %vm274_vm2, %v525_v61 }
 0x5cc   : > { %v1231_v63 = vpop.eup %1230  ;;  %1127 = vmatpush3.msra.mxu0 %v698_v62  ;;  %1128 = vmatprep.mubr.msk.f32.mxu0 %vm1369_vm0, %v1368_v0 }
 0x5cd   : > { %v696_v1 = vmul.f32 %v1231_v63, %v1225_v53  ;;  %1136 = vmatprep.subr.mxu0 %v1368_v0 }
 0x5cf   : > { %1129 = vmatmul.mubr.msk.f32.vlgmr.msra.gmra.mrb[6].mxu0 %vm274_vm2, %v696_v1 }
 0x5d0   : > { %v1233_v3 = vpop.eup %1232  ;;  %1137 = vmatpush3.msra.mxu0 %v869_v2  ;;  %1138 = vmatprep.mubr.msk.f32.mxu0 %vm1369_vm0, %v1368_v0 }
 0x5d1   : > { %v867_v4 = vmul.f32 %v1233_v3, %v1227_v55 }
 0x5d3   : > { %1139 = vmatmul.mubr.msk.f32.vlgmr.msra.gmra.mrb[8].mxu0 %vm274_vm2, %v867_v4 }
 0x69e   : > { %v598_v5 = vpop.f32.mrb[4].mxu0 }
 0x69f   : > { %603 = vrot.lane.b32.xlu1 %v598_v5, %s1381_s22  ;;  %v1120_v6 = vpop.f32.mrb[5].mxu0 }
 0x6a2   : > { %v769_v7 = vpop.f32.mrb[6].mxu0 }
 0x6a3   : > { %774 = vrot.lane.b32.xlu0 %v769_v7, %s1382_s6  ;;  %v1130_v8 = vpop.f32.mrb[7].mxu0 }
 0x6a6   : > { %v940_v9 = vpop.f32.mrb[8].mxu0 }
 0x6a7   : > { %945 = vrot.lane.b32.xlu1 %v940_v9, %s1383_s7  ;;  %v1140_v0 = vpop.f32.mrb[9].mxu0 }
 0x711   : > { %v604_v10 = vpop.permute.xlu1 %603 }
 0x712   : > { %607 = vst.msk [vmem:[%s1604_s27] sm:$0xff] %vm606_vm3, %v604_v10 }
 0x715   : > { %v775_v11 = vpop.permute.xlu0 %774 }
 0x716   : > { %778 = vst.msk [vmem:[%s1604_s27] sm:$0xff] %vm777_vm4, %v775_v11 }
 0x719   : > { %v946_v12 = vpop.permute.xlu1 %945 }
 0x71a   : > { %949 = vst.msk [vmem:[%s1604_s27] sm:$0xff] %vm948_vm5, %v946_v12 }
 0x71b   : > { %1305 = shalt.err (!%p1302_p7)
}
 0x71c   : > { %s1306_s30 = scalar_lea.hbm %s1633_s26, 128  ;;  %s1310_s28 = scalar_lea.hbm %s1681_s3, 256 }
 0x71d   : > { %p1307_p9 = scmp.ne.s32.totalorder %s1633_s26, %s1306_s30  ;;  %p1311_p0 = scmp.lt.u32.totalorder %s1633_s26, %s1681_s3 }
 0x71e   : > { %p1312_p11 = scmp.lt.u32.totalorder %s1310_s28, %s1306_s30  ;;  %p1314_p4 = scmp.lt.u32.totalorder %s1306_s30, %s1633_s26 }
 0x71f   : > { %p1308_p2 = pnand %p1307_p9, %p1496_p12 }
 0x720   : > { %p1313_p1 = por %p1312_p11, %p1311_p0 }
 0x721   : > { %p1309_p5 = pneg %p1308_p2 }
 0x722   : > { %p1315_p6 = por %p1314_p4, %p1313_p1 }
 0x724   : > { %p1316_p8 = pnand %p1315_p6, %p1309_p5 }
 0x726   : > { %1319 = shalt.err (!%p1316_p8)
}
 0x727   : > { %1147 = dma.vmem_to_hbm [thread:$0]  (%p1496_p12), %s1635_s20, 128, %s1633_s26, %s951_s5  }
 0x728 PF: > { %s976_s22 = sand.u32 1, %s1350_s12   ;;  %p1696_p10 = scmp.ne.s32.totalorder %s1686_s19, 0 }
 0x729   : > { %p1697_p13 = scmp.ge.s32.totalorder %s1362_s15, 2  ;;  %s977_s6 = scalar_lea.sflag [#allocation4], %s976_s22 }
 0x72b   : > { %p1158_p3 = pnand %p1697_p13, %p1696_p10 }
 0x72d   : > { %1345 = dma.done.wait (!%p1158_p3), %s977_s6, 128  }
 0x72e   : > { %1347 = vsyncadd (!%p1158_p3), %s977_s6, 4294967168  ;;  %p17_p7 = scmp.ge.s32.totalorder %s1461_s24, 4   ;;  %s1698_s12 = smov %s1354_s13 }
 0x72f   : > { %s1699_s13 = smov %s1358_s14  ;;  %s1700_s14 = smov %s1492_s17 }
 0x730   : > { %s1701_s15 = smov %s1461_s24  ;;  %19 = sbr.rel (!%p17_p7) target bundleno = 6 (0x6), region = 81 }
 0x737   :  { %982 = vsyncpa [#allocation3], 1 }
 0x738   :  { %984 = vsyncpa [#allocation3 + $0x1], 1 }
 0x739   :  { %985 = vsyncpa [#allocation6], 1 }
 0x73a   :  { %986 = vsyncpa [#allocation4], 1 }
 0x73b   :  { %988 = vsyncpa [#allocation4 + $0x1], 1 }

</bundles_post_ra>
